<compile_context>
chip_gen: v5e
topology: v5e:2x2
jax: 0.10.0
libtpu: 0.0.40
codegen_flags: <defaults>
</compile_context>

<pallas_src>
import jax
import jax.numpy as jnp
from jax.experimental import pallas as pl
from jax.experimental.pallas import tpu as pltpu


def _classifier_kernel(x_ref, w_ref, b_ref, o_ref, acc_ref):
    # x_ref : (TN, C, THW)  activations, native dtype (bf16/f32)
    # w_ref : (C, Kp)       f32 weight, pre-transposed and pre-scaled by 1/(H*W)
    # b_ref : (1, Kp)       f32 bias, zero-padded to Kp lanes
    # o_ref : (TN, Kp)      f32 output tile (lane-dense; sliced back to K on host)
    # acc_ref: (TN, C)      f32 VMEM accumulator for the pooling sum
    k = pl.program_id(1)

    @pl.when(k == 0)
    def _init():
        acc_ref[...] = jnp.zeros_like(acc_ref)

    # Partial global-average-pool: accumulate the sum over this HW tile in f32.
    acc_ref[...] += jnp.sum(x_ref[...].astype(jnp.float32), axis=-1)

    @pl.when(k == pl.num_programs(1) - 1)
    def _finalize():
        # Tiny (TN, C) @ (C, Kp) + bias; 1/(H*W) already folded into w.
        o_ref[...] = (
            jnp.dot(acc_ref[...], w_ref[...], preferred_element_type=jnp.float32)
            + b_ref[...]
        )


def _pick_block_n(n):
    """Batch tile: the full batch, or a multiple of 8 that divides it."""
    if n <= 8 or n % 8 != 0:
        return n
    for tn in (64, 32, 16, 8):
        if n % tn == 0:
            return tn
    return n


def _pick_block_hw(hw, block_n, c, itemsize,
                   vmem_x_budget_bytes=20 * 1024 * 1024, max_block=2048):
    """HW tile: a multiple of 128 dividing HW exactly that fits the (double
    buffered) VMEM budget, else the full HW extent."""
    if hw % 128 != 0:
        return hw
    cap = vmem_x_budget_bytes // (2 * block_n * c * itemsize)
    cap = min(cap, max_block, hw)
    best = 128
    t = 128
    while t <= cap:
        if hw % t == 0:
            best = t
        t += 128
    return best


def classifier_module_forward(x_list, weight, bias, *, block_n=None, block_hw=None):
    """x_list: list of NCHW arrays (only x[-1] is used, as in the module).
    weight: (K, C) nn.Linear weight.  bias: (K,).  Returns (N, K) f32 logits."""
    x_last = x_list[-1]
    n, c, h, w = x_last.shape
    hw = h * w
    k = weight.shape[0]
    kp = ((k + 127) // 128) * 128

    # Keep x in its native dtype; the kernel casts per-tile to f32.
    x3 = x_last.reshape(n, c, hw)
    itemsize = jnp.dtype(x3.dtype).itemsize

    tn = block_n if block_n is not None else _pick_block_n(n)
    thw = block_hw if block_hw is not None else _pick_block_hw(hw, tn, c, itemsize)
    assert n % tn == 0 and hw % thw == 0, "tile sizes must divide (N, H*W) exactly"

    # Fold the 1/(H*W) pooling scale into the weight; pad K to a lane-dense 128.
    wt = weight.T.astype(jnp.float32) / float(hw)          # (C, K)
    wt = jnp.pad(wt, ((0, 0), (0, kp - k)))                # (C, Kp)
    b2 = jnp.pad(bias.astype(jnp.float32), (0, kp - k)).reshape(1, kp)

    grid = (n // tn, hw // thw)

    cost = pl.CostEstimate(
        flops=int(n * c * hw + 2 * n * c * kp),
        transcendentals=0,
        bytes_accessed=int(x3.size * itemsize + wt.size * 4 + b2.size * 4 + n * kp * 4),
    )

    out = pl.pallas_call(
        _classifier_kernel,
        out_shape=jax.ShapeDtypeStruct((n, kp), jnp.float32),
        grid_spec=pltpu.PrefetchScalarGridSpec(
            num_scalar_prefetch=0,
            grid=grid,
            in_specs=[
                pl.BlockSpec((tn, c, thw), lambda i, j: (i, 0, j)),  # x: pipelined DMA
                pl.BlockSpec((c, kp), lambda i, j: (0, 0)),          # weight: resident
                pl.BlockSpec((1, kp), lambda i, j: (0, 0)),          # bias: resident
            ],
            out_specs=pl.BlockSpec((tn, kp), lambda i, j: (i, 0)),
            scratch_shapes=[pltpu.VMEM((tn, c), jnp.float32)],
        ),
        compiler_params=pltpu.CompilerParams(
            dimension_semantics=("parallel", "arbitrary"),
            vmem_limit_bytes=32 * 1024 * 1024,
        ),
        cost_estimate=cost,
    )(x3, wt, b2)

    return out[:, :k]


def classifier_module_reference(x_list, weight, bias):
    """Pure-JAX reference for correctness check."""
    x_last = x_list[-1].astype(jnp.float32)
    pooled = jnp.mean(x_last, axis=(2, 3))                 # (N, C)
    return pooled @ weight.T.astype(jnp.float32) + bias.astype(jnp.float32)


if __name__ == "__main__":
    key = jax.random.PRNGKey(0)
    k0, k1, k2, k3, k4 = jax.random.split(key, 5)

    # Case 1: f32 maps, batch=2, channels=4, 16x16, 10 classes; force
    # block_hw=128 so the HW-tiled accumulation path (2 k-steps) is exercised.
    N, C, H, W, K = 2, 4, 16, 16, 10
    x_scale0 = jax.random.normal(k0, (N, C, 2 * H, 2 * W), dtype=jnp.float32)
    x_scale1 = jax.random.normal(k1, (N, C, H, W), dtype=jnp.float32)
    x_list = [x_scale0, x_scale1]

    bound = 1.0 / (C ** 0.5)
    weight = jax.random.uniform(k2, (K, C), minval=-bound, maxval=bound,
                                dtype=jnp.float32)
    bias = jax.random.uniform(k3, (K,), minval=-bound, maxval=bound,
                              dtype=jnp.float32)

    out = classifier_module_forward(x_list, weight, bias, block_hw=128)
    out = jax.block_until_ready(out)
    ref = classifier_module_reference(x_list, weight, bias)
    assert out.shape == (N, K)
    assert jnp.allclose(out, ref, atol=1e-5, rtol=1e-5), "case 1 mismatch"

    # Case 2: bf16 activations end-to-end (no host up-cast), larger batch so the
    # batch axis is tiled into two parallel (megacore-shardable) TN=8 tiles.
    N2, C2, H2, W2 = 16, 8, 8, 8
    xb = jax.random.normal(k4, (N2, C2, H2, W2), dtype=jnp.float32).astype(jnp.bfloat16)
    w2 = jax.random.uniform(k2, (K, C2), minval=-0.5, maxval=0.5, dtype=jnp.float32)
    b2 = jax.random.uniform(k3, (K,), minval=-0.5, maxval=0.5, dtype=jnp.float32)

    out2 = classifier_module_forward([xb], w2, b2, block_n=8)
    out2 = jax.block_until_ready(out2)
    ref2 = classifier_module_reference([xb], w2, b2)
    assert out2.shape == (N2, K)
    assert jnp.allclose(out2, ref2, atol=1e-3, rtol=1e-3), "case 2 mismatch"

    print("KERNEL_OK")
</pallas_src>

<mosaic_0001>
module attributes {stable_mosaic.version = 11 : i64} {
  func.func @_classifier_kernel(%arg0: i32, %arg1: i32, %arg2: memref<2x4x128xf32, #tpu.memory_space<vmem>>, %arg3: memref<4x128xf32, #tpu.memory_space<vmem>>, %arg4: memref<1x128xf32, #tpu.memory_space<vmem>>, %arg5: memref<2x128xf32, #tpu.memory_space<vmem>>, %arg6: memref<2x4xf32, #tpu.memory_space<vmem>>) attributes {dimension_semantics = [#tpu.dimension_semantics<parallel>, #tpu.dimension_semantics<arbitrary>], iteration_bounds = array<i64: 1, 2>, scalar_prefetch = 0 : i64, scratch_operands = 1 : i64, tpu.core_type = #tpu.core_type<tc>, window_params = [{transform_indices = @transform_0, window_bounds = array<i64: 2, 4, 128>}, {pipeline_mode = #tpu.pipeline_mode<synchronous>, transform_indices = @transform_1, window_bounds = array<i64: 4, 128>}, {pipeline_mode = #tpu.pipeline_mode<synchronous>, transform_indices = @transform_2, window_bounds = array<i64: 1, 128>}, {transform_indices = @transform_3, window_bounds = array<i64: 2, 128>}]} {
    %c0_i32 = arith.constant 0 : i32
    %0 = arith.cmpi eq, %arg1, %c0_i32 : i32
    %1 = arith.extui %0 : i1 to i32
    %c0_i32_0 = arith.constant 0 : i32
    %2 = arith.cmpi ne, %1, %c0_i32_0 : i32
    scf.if %2 {
      %cst_8 = arith.constant 0.000000e+00 : f32
      %11 = vector.broadcast %cst_8 : f32 to vector<2x4xf32>
      %c0_9 = arith.constant 0 : index
      %c0_10 = arith.constant 0 : index
      %12 = vector.load %arg6[%c0_9, %c0_10] : memref<2x4xf32, #tpu.memory_space<vmem>>, vector<2x4xf32>
      tpu.vector_store %arg6[%c0_9, %c0_10], %11 {strides = array<i32>} : memref<2x4xf32, #tpu.memory_space<vmem>>, vector<2x4xf32>,
    } else {
    }
    %c0 = arith.constant 0 : index
    %c0_1 = arith.constant 0 : index
    %3 = vector.load %arg6[%c0, %c0_1] : memref<2x4xf32, #tpu.memory_space<vmem>>, vector<2x4xf32>
    %c0_2 = arith.constant 0 : index
    %c0_3 = arith.constant 0 : index
    %c0_4 = arith.constant 0 : index
    %4 = vector.load %arg2[%c0_2, %c0_3, %c0_4] : memref<2x4x128xf32, #tpu.memory_space<vmem>>, vector<2x4x128xf32>
    %cst = arith.constant dense<0.000000e+00> : vector<2x4xf32>
    %5 = vector.multi_reduction <add>, %4, %cst [2] : vector<2x4x128xf32> to vector<2x4xf32>
    %6 = arith.addf %3, %5 : vector<2x4xf32>
    %c0_5 = arith.constant 0 : index
    %c0_6 = arith.constant 0 : index
    %7 = vector.load %arg6[%c0_5, %c0_6] : memref<2x4xf32, #tpu.memory_space<vmem>>, vector<2x4xf32>
    tpu.vector_store %arg6[%c0_5, %c0_6], %6 {strides = array<i32>} : memref<2x4xf32, #tpu.memory_space<vmem>>, vector<2x4xf32>,
    %c1_i32 = arith.constant 1 : i32
    %8 = arith.cmpi eq, %arg1, %c1_i32 : i32
    %9 = arith.extui %8 : i1 to i32
    %c0_i32_7 = arith.constant 0 : i32
    %10 = arith.cmpi ne, %9, %c0_i32_7 : i32
    scf.if %10 {
      %c0_8 = arith.constant 0 : index
      %c0_9 = arith.constant 0 : index
      %11 = vector.load %arg6[%c0_8, %c0_9] : memref<2x4xf32, #tpu.memory_space<vmem>>, vector<2x4xf32>
      %c0_10 = arith.constant 0 : index
      %c0_11 = arith.constant 0 : index
      %12 = vector.load %arg3[%c0_10, %c0_11] : memref<4x128xf32, #tpu.memory_space<vmem>>, vector<4x128xf32>
      %cst_12 = arith.constant dense<0.000000e+00> : vector<2x128xf32>
      %13 = tpu.matmul %11, %12, %cst_12 {dimension_numbers = #tpu.dot_dimension_numbers<[1], [0], [0], [1], [0, 0, 1, 1], [], []>} : vector<2x4xf32>, vector<4x128xf32>, vector<2x128xf32> -> vector<2x128xf32>
      %c0_13 = arith.constant 0 : index
      %c0_14 = arith.constant 0 : index
      %14 = vector.load %arg4[%c0_13, %c0_14] : memref<1x128xf32, #tpu.memory_space<vmem>>, vector<1x128xf32>
      %15 = vector.broadcast %14 : vector<1x128xf32> to vector<2x128xf32>
      %16 = arith.addf %13, %15 : vector<2x128xf32>
      %c0_15 = arith.constant 0 : index
      %c0_16 = arith.constant 0 : index
      %17 = vector.load %arg5[%c0_15, %c0_16] : memref<2x128xf32, #tpu.memory_space<vmem>>, vector<2x128xf32>
      tpu.vector_store %arg5[%c0_15, %c0_16], %16 {strides = array<i32>} : memref<2x128xf32, #tpu.memory_space<vmem>>, vector<2x128xf32>,
    } else {
    }
    return
  }
  func.func @transform_0(%arg0: i32, %arg1: i32) -> (i32, i32, i32) {
    %c0_i32 = arith.constant 0 : i32
    %c0_i32_0 = arith.constant 0 : i32
    return %arg0, %c0_i32, %arg1 : i32, i32, i32
  }
  func.func @transform_1(%arg0: i32, %arg1: i32) -> (i32, i32) {
    %c0_i32 = arith.constant 0 : i32
    %c0_i32_0 = arith.constant 0 : i32
    %c0_i32_1 = arith.constant 0 : i32
    return %c0_i32, %c0_i32_0 : i32, i32
  }
  func.func @transform_2(%arg0: i32, %arg1: i32) -> (i32, i32) {
    %c0_i32 = arith.constant 0 : i32
    %c0_i32_0 = arith.constant 0 : i32
    %c0_i32_1 = arith.constant 0 : i32
    return %c0_i32, %c0_i32_0 : i32, i32
  }
  func.func @transform_3(%arg0: i32, %arg1: i32) -> (i32, i32) {
    %c0_i32 = arith.constant 0 : i32
    %c0_i32_0 = arith.constant 0 : i32
    return %arg0, %c0_i32 : i32, i32
  }
}

</mosaic_0001>

<bundles_post_ra>
// kernel: tpu_custom_call.1
= control target key start
LH: loop header
LB: loop body
LE: loop exit
PB: predicated region body
PF: predicated region fallthrough
CT: control target
= control target key end

     0   :  { %8 = vsyncpa [#allocation4], 0  ;;  %s764_s0 = inlined_call_operand.hbm [shape: f32[2,4,256], index: 0, kind: input, shape index: {}]   ;;  %s765_s1 = inlined_call_operand.hbm [shape: f32[4,128], index: 1, kind: input, shape index: {}]   ;;  %s766_s2 = inlined_call_operand.vmem [shape: f32[1,128], index: 2, kind: input, shape index: {}]   ;;  %s767_s3 = inlined_call_operand.hbm [shape: f32[2,128], index: 3, kind: output, shape index: {}]  }
   0x1   :  { %10 = vsyncpa [#allocation4 + $0x1], 0 }
   0x2   :  { %11 = vsyncpa [#allocation7], 0 }
   0x3   :  { %12 = vsyncpa [#allocation5], 0  ;;  %s635_s12 = smov 0   ;;  %s637_s13 = smov 0  }
   0x4   :  { %s639_s14 = smov 0   ;;  %s641_s15 = smov 0  }
   0x5   :  { %s643_s16 = smov 0   ;;  %s645_s17 = smov 0  }
   0x6 LB: > { %s366_s18 = sadd.s32 4294967295, %s607_s17   ;;  %s39_s19 = sadd.s32 1, %s595_s14  ;;  %s607_s17 = sphi %s645_s17, %s18_s17   ;;  %s603_s16 = sphi %s643_s16, %s777_s16   ;;  %s599_s15 = sphi %s641_s15, %s776_s15   ;;  %s595_s14 = sphi %s639_s14, %s775_s14   ;;  %s591_s13 = sphi %s637_s13, %s774_s13   ;;  %s587_s12 = sphi %s635_s12, %s773_s12  }
   0x7   : > { %p46_p0 = scmp.ne.s32.totalorder %s595_s14, %s591_s13  ;;  %p47_p1 = scmp.eq.s32.totalorder %s607_s17, 0 }
   0x8   : > { %p52_p2 = scmp.ne.s32.totalorder %s591_s13, %s587_s12  ;;  %p671_p3 = scmp.eq.s32.totalorder %s366_s18, 0 }
   0x9   : > { %p675_p4 = por %p47_p1, %p46_p0  ;;  %p367_p5 = scmp.ge.s32.totalorder %s607_s17, 1 }
   0xa   : > { %p682_p6 = por %p671_p3, %p52_p2  ;;  %p131_p7 = scmp.lt.s32.totalorder %s607_s17, 3 }
   0xb   : > { %s143_s25 = sshll.u32 %s765_s1, 4  ;;  %s609_s27 = smov [#allocation6]   ;;  %s144_s25 = int_to_ptr.hbm [resolvable:$true] %s143_s25 }
   0xc   : > { %p690_p8 = pnand %p367_p5, %p131_p7  ;;  %s145_s28 = sshll.u32 %s609_s27, 4  ;;  %s146_s28 = int_to_ptr.vmem [resolvable:$true] %s145_s28 }
   0xd   : > { %p402_p10 = scmp.lt.s32.totalorder %s607_s17, 2  ;;  %s27_s30 = sadd.s32 1, %s603_s16 }
   0xe   : > { %p393_p9 = pneg %p690_p8  ;;  %p28_p13 = scmp.ge.s32.totalorder %s27_s30, 2 }
   0xf   : > { %p701_p12 = pnand %p402_p10, %p675_p4  ;;  %s159_s4 = sand.u32 1, %s595_s14  }
  0x10   : > { %p394_p11 = pnand %p393_p9, %p671_p3  ;;  %s371_s5 = sshll.u32 %s603_s16, 2 }
  0x11   : > { %s779_s30 = smov (%p28_p13, %s27_s30), 0  ;;  %s370_s6 = sshll.u32 %s159_s4, 3 }
  0x12   : > { %396 = dma.hbm_to_vmem [thread:$0]  (!%p394_p11), %s144_s25, 64, %s146_s28, [#allocation7]  }
  0x13   : > { %s35_s7 = ssub.s32 %s603_s16, %s779_s30  ;;  %s170_s10 = scalar_lea.hbm %s764_s0, %s371_s5 }
  0x14   : > { %p37_p0 = scmp.eq.s32.totalorder %s35_s7, 0  ;;  %s171_s11 = sshll.u32 %s170_s10, 4  ;;  %s172_s11 = int_to_ptr.hbm [resolvable:$true] %s171_s11 }
  0x15   : > { %s163_s12 = scalar_lea.vmem [#allocation3], %s370_s6  ;;  %s160_s24 = scalar_lea.sflag [#allocation4], %s159_s4 }
  0x16   : > { %s173_s21 = sshll.u32 %s163_s12, 4  ;;  %s610_s25 = smov 128   ;;  %s174_s21 = int_to_ptr.vmem [resolvable:$true] %s173_s21 }
  0x17   : > { %s718_s23 = scalar_select %p37_p0, %s595_s14, %s39_s19  }
  0x18   : > { %s611_s27 = smov 64   ;;  %s612_s28 = smov 4  }
  0x19   : > { %400 = dma.hbm_to_vmem [thread:$0]  (!%p701_p12), %s172_s11, 128, %s174_s21, %s160_s24, %s610_s25, %s611_s27, %s612_s28  }
  0x1a   : > { %185 = sbr.rel (%p690_p8) target bundleno = 317 (0x13d), region = 32  ;;  %s187_s5 = sand.u32 (!%p690_p8), 1, %s591_s13  }
  0x1b   : > { %s373_s7 = sshll.u32 (!%p690_p8), %s187_s5, 3  ;;  %s188_s6 = scalar_lea.sflag (!%p690_p8), [#allocation4], %s187_s5 }
  0x1c   : > { %s191_s8 = scalar_lea.vmem (!%p690_p8), [#allocation3], %s373_s7 }
  0x1f   : > { %574 = dma.done.wait (%p682_p6), %s188_s6, 128  }
  0x20   : > { %576 = vsyncadd (%p682_p6), %s188_s6, 4294967168 }
  0x21   : > { %578 = dma.done.wait (%p671_p3), [#allocation7], 64  }
  0x22   : > { %580 = vsyncadd (%p671_p3), [#allocation7], 4294967232  ;;  %p375_p1 = scmp.ne.s32.totalorder %s599_s15, 0 }
  0x24   : > { %219 = sbr.rel (%p375_p1) target bundleno = 43 (0x2b), region = 44 }
  0x29   : > { %vm220_vm0 = vcmask 25600   ;;  %v613_v0 = vmov 0.0  }
  0x2a   : > { %221 = vst.msk [vmem:[#allocation2] sm:$0x3] %vm220_vm0, %v613_v0 }
  0x2b PF: > { %v223_v1 = vld [vmem:[%s191_s8] sm:$0xf]  ;;  %vm225_vm1 = vcmask 1043456   ;;  %v224_v3 = vld [vmem:[%s191_s8 + $0x4] sm:$0xf]  ;;  %v234_v6 = vlaneseq  ;;  %vm238_vm2 = vcmask 1041409  }
  0x2c   : > { %v226_v2 = vsel %vm225_vm1, %v223_v1, 0.0  ;;  %v229_v4 = vsel %vm225_vm1, %v224_v3, 0.0  ;;  %vm242_vm3 = vcmask 25600   ;;  %p376_p2 = scmp.ne.s32.totalorder %s599_s15, 1 }
  0x2d   : > { %227 = vadd.xlane.f32.xlu0 %v226_v2  ;;  %v235_v7 = vand.u32 127, %v234_v6 }
  0x31   : > { %v222_v10 = vld [vmem:[#allocation2] sm:$0x3] }
  0x35   : > { %230 = vadd.xlane.f32.xlu0 %v229_v4 }
  0xa0   : > { %v228_v5 = vpop.xlane.xlu0 %227 }
  0xa1   : > { %v236_v9 = vperm.slane %v228_v5, %v235_v7 }
  0xa8   : > { %v231_v8 = vpop.xlane.xlu0 %230 }
  0xa9   : > { %v237_v11 = vperm.slane %v231_v8, %v235_v7 }
  0xaa   : > { %247 = sbr.rel (%p376_p2) target bundleno = 311 (0x137), region = 48 }
  0xab   : > { %v239_v12 = vsel %vm238_vm2, %v237_v11, %v236_v9 }
  0xac   : > { %v241_v13 = vadd.f32 %v239_v12, %v222_v10 }
  0xae   : > { %243 = vst.msk [vmem:[#allocation2] sm:$0x3] %vm242_vm3, %v241_v13 }
  0xaf   : > { %v249_v14 = vld [vmem:[#allocation6] sm:$0xf]  ;;  %vm254_vm4 = vcmask 31744   ;;  %v460_v16 = vld [vmem:[%s766_s2] ss:$0 sm:$0xff] }
  0xb0   : > { %377 = vmatpush.msk.msra.mxu0 %vm225_vm1, %v249_v14 }
  0xb5   : > { %v248_v15 = vld [vmem:[#allocation2] sm:$0x3] }
  0xb6   : > { %378 = vmatmul.msk.f32.vlgmr.msra.gmra.mxu0 %vm254_vm4, %v248_v15 }
 0x133   : > { %v278_v17 = vpop.f32.mrf.mxu0 }
 0x134   : > { %v279_v18 = vadd.f32 %v460_v16, %v278_v17 }
 0x136   : > { %281 = vst [vmem:[#allocation8] sm:$0x3] %v279_v18 }
 0x137 PF: > { %p404_p3 = scmp.eq.s32.totalorder %s366_s18, 1  ;;  %s292_s26 = sshll.u32 %s767_s3, 4  ;;  %s293_s26 = int_to_ptr.hbm [resolvable:$true] %s292_s26 }
 0x138   : > { %s614_s29 = smov [#allocation8]  }
 0x139   : > { %s290_s4 = sshll.u32 %s614_s29, 4  ;;  %s291_s4 = int_to_ptr.vmem [resolvable:$true] %s290_s4 }
 0x13a   : > { %390 = dma.vmem_to_hbm [thread:$0]  (%p404_p3), %s291_s4, 32, %s293_s26, [#allocation5]  }
 0x13b   : > { %582 = dma.done.wait (%p404_p3), [#allocation5], 32  }
 0x13c   : > { %584 = vsyncadd (%p404_p3), [#allocation5], 4294967264 }
 0x13d PF: > { %s18_s17 = sadd.s32 1, %s607_s17   ;;  %s773_s12 = smov %s591_s13 }
 0x13e   : > { %p15_p4 = scmp.ge.s32.totalorder %s18_s17, 4   ;;  %s774_s13 = smov %s595_s14 }
 0x13f   : > { %s775_s14 = smov %s718_s23  ;;  %s776_s15 = smov %s603_s16 }
 0x140   : > { %s777_s16 = smov %s779_s30  ;;  %17 = sbr.rel (!%p15_p4) target bundleno = 6 (0x6), region = 82 }
 0x145   :  { %306 = vsyncpa [#allocation4], 1 }
 0x146   :  { %308 = vsyncpa [#allocation4 + $0x1], 1 }
 0x147   :  { %309 = vsyncpa [#allocation7], 1 }
 0x148   :  { %310 = vsyncpa [#allocation5], 1 }
 0x149   :  { %312 = vsyncpa [#allocation5 + $0x1], 1 }

</bundles_post_ra>
